<compile_context>
chip_gen: v7x
topology: tpu7x:2x2x1
jax: 0.10.0
libtpu: 0.0.40
codegen_flags: <defaults>
</compile_context>

<pallas_src>
import functools

import jax
import jax.numpy as jnp
import numpy as np
from jax.experimental import pallas as pl
from jax.experimental.pallas import tpu as pltpu


def cboh_kernel(idx_ref, w_ref, b_ref, out_ref):
    """idx_ref: (TN, C) int32; w_ref: (Hp, Hp) bf16 fused emb @ W^T;
    b_ref: (1, Hp) f32; out_ref: (TN, Hp) f32."""
    idx = idx_ref[...]                                   # (TN, C)
    tn, c_ctx = idx.shape
    hp = w_ref.shape[0]

    # Multi-hot counts over the C context slots: counts @ emb == gathered sum,
    # duplicates in the context are counted (matches embedding(...).sum(dim=1)).
    hero_ids = jax.lax.broadcasted_iota(jnp.int32, (tn, hp), dimension=1)
    counts = jnp.zeros((tn, hp), dtype=jnp.float32)
    for c in range(c_ctx):                               # small static unroll (VPU compares)
        counts = counts + (hero_ids == idx[:, c][:, None]).astype(jnp.float32)

    # Single lane-dense bf16 MXU matmul with f32 accumulation.
    out = jnp.dot(counts.astype(jnp.bfloat16), w_ref[...],
                  preferred_element_type=jnp.float32)    # (TN, Hp) f32
    out_ref[...] = out + b_ref[...]                      # bias broadcast


def _round_up(x, m):
    return pl.cdiv(x, m) * m


@functools.partial(jax.jit, static_argnames=("block_n",))
def cboh_forward(indices, emb_table, affine_w, affine_b, *, block_n=256):
    """CBOH forward.

    indices:   (N, C) int32 context hero ids
    emb_table: (H, D) f32 embedding weights
    affine_w:  (H, D) f32 nn.Linear weight (PyTorch layout)
    affine_b:  (H,)   f32 nn.Linear bias
    returns:   (N, H) f32
    """
    n, c_ctx = indices.shape
    h, d = emb_table.shape

    # Fuse the two matmuls once outside the kernel: (H, D) @ (D, H) -> (H, H).
    fused_w = jnp.dot(emb_table, affine_w.T, preferred_element_type=jnp.float32)

    # Pad H to a multiple of 128 (lane-dense output stores) and N to a
    # multiple of the row tile (which must itself be a multiple of 8).
    hp = _round_up(h, 128)
    block_n = min(block_n, _round_up(n, 8))
    np_rows = _round_up(n, block_n)

    fused_w = jnp.pad(fused_w, ((0, hp - h), (0, hp - h))).astype(jnp.bfloat16)
    bias = jnp.pad(affine_b.reshape(1, h).astype(jnp.float32),
                   ((0, 0), (0, hp - h)))
    idx = jnp.pad(indices.astype(jnp.int32), ((0, np_rows - n), (0, 0)))

    grid = (np_rows // block_n,)
    out = pl.pallas_call(
        cboh_kernel,
        out_shape=jax.ShapeDtypeStruct((np_rows, hp), jnp.float32),
        grid=grid,
        in_specs=[
            pl.BlockSpec((block_n, c_ctx), lambda i: (i, 0)),   # index tile (pipelined)
            pl.BlockSpec((hp, hp), lambda i: (0, 0)),           # fused weight (resident)
            pl.BlockSpec((1, hp), lambda i: (0, 0)),            # bias (resident)
        ],
        out_specs=pl.BlockSpec((block_n, hp), lambda i: (i, 0)),
        compiler_params=pltpu.CompilerParams(
            dimension_semantics=("parallel",),
        ),
    )(idx, fused_w, bias)
    return out[:n, :h]


def cboh_reference(indices, emb_table, affine_w, affine_b):
    embeds = emb_table[indices].sum(axis=1)          # (N, D)
    return embeds @ affine_w.T + affine_b            # (N, H)


if __name__ == "__main__":
    key = jax.random.PRNGKey(0)
    k_idx, k_emb, k_w, k_b = jax.random.split(key, 4)

    heropool_size = 128   # H
    embedding_dim = 32    # D
    batch = 32            # N
    context = 4           # module forward expects (N, 4)

    # Deterministic parameter init. Embedding follows the module's
    # uniform(-0.5/D, 0.5/D) init. The module zero-inits the affine layer
    # (which would make the forward trivially zero), so small random values
    # are used here to exercise the kernel's matmul path.
    initrange = 0.5 / embedding_dim
    emb_table = jax.random.uniform(
        k_emb, (heropool_size, embedding_dim), jnp.float32,
        minval=-initrange, maxval=initrange)
    affine_w = jax.random.uniform(
        k_w, (heropool_size, embedding_dim), jnp.float32, minval=-0.1, maxval=0.1)
    affine_b = jax.random.uniform(
        k_b, (heropool_size,), jnp.float32, minval=-0.1, maxval=0.1)

    indices = jax.random.randint(
        k_idx, (batch, context), minval=0, maxval=heropool_size, dtype=jnp.int32)

    # block_n=16 -> 2 grid steps at this toy batch; raise (e.g. 1024+ on
    # v5e/v6e, ~half that on v7x) for production batch sizes.
    out = cboh_forward(indices, emb_table, affine_w, affine_b, block_n=16)
    out = jax.block_until_ready(out)

    ref = cboh_reference(np.asarray(indices), np.asarray(emb_table),
                         np.asarray(affine_w), np.asarray(affine_b))
    assert out.shape == (batch, heropool_size)
    # bf16 fused weight -> slightly looser tolerance than the pure-f32 path.
    np.testing.assert_allclose(np.asarray(out), ref, rtol=2e-2, atol=2e-3)

    print("KERNEL_OK")
</pallas_src>

<mosaic_0001>
module attributes {stable_mosaic.version = 11 : i64} {
  func.func @cboh_kernel(%arg0: i32, %arg1: memref<16x4xi32, #tpu.memory_space<vmem>>, %arg2: memref<128x128xbf16, #tpu.memory_space<vmem>>, %arg3: memref<1x128xf32, #tpu.memory_space<vmem>>, %arg4: memref<16x128xf32, #tpu.memory_space<vmem>>) attributes {dimension_semantics = [#tpu.dimension_semantics<parallel>], iteration_bounds = array<i64: 2>, scalar_prefetch = 0 : i64, scratch_operands = 0 : i64, tpu.core_type = #tpu.core_type<tc>, window_params = [{transform_indices = @transform_0, window_bounds = array<i64: 16, 4>}, {pipeline_mode = #tpu.pipeline_mode<synchronous>, transform_indices = @transform_1, window_bounds = array<i64: 128, 128>}, {pipeline_mode = #tpu.pipeline_mode<synchronous>, transform_indices = @transform_2, window_bounds = array<i64: 1, 128>}, {transform_indices = @transform_3, window_bounds = array<i64: 16, 128>}]} {
    %c0 = arith.constant 0 : index
    %c0_0 = arith.constant 0 : index
    %0 = vector.load %arg1[%c0, %c0_0] : memref<16x4xi32, #tpu.memory_space<vmem>>, vector<16x4xi32>
    %1 = tpu.iota {dimensions = array<i32: 1>} : vector<16x128xi32>
    %cst = arith.constant 0.000000e+00 : f32
    %2 = vector.broadcast %cst : f32 to vector<16x128xf32>
    %3 = vector.extract_strided_slice %0 {offsets = [0, 0], sizes = [16, 1], strides = [1, 1]} : vector<16x4xi32> to vector<16x1xi32>
    %4 = vector.shape_cast %3 : vector<16x1xi32> to vector<16xi32>
    %5 = vector.shape_cast %4 : vector<16xi32> to vector<16x1xi32>
    %6 = vector.broadcast %5 : vector<16x1xi32> to vector<16x128xi32>
    %7 = arith.cmpi eq, %1, %6 : vector<16x128xi32>
    %8 = arith.extui %7 : vector<16x128xi1> to vector<16x128xi32>
    %9 = arith.sitofp %8 : vector<16x128xi32> to vector<16x128xf32>
    %10 = arith.addf %2, %9 : vector<16x128xf32>
    %11 = vector.extract_strided_slice %0 {offsets = [0, 1], sizes = [16, 1], strides = [1, 1]} : vector<16x4xi32> to vector<16x1xi32>
    %12 = vector.shape_cast %11 : vector<16x1xi32> to vector<16xi32>
    %13 = vector.shape_cast %12 : vector<16xi32> to vector<16x1xi32>
    %14 = vector.broadcast %13 : vector<16x1xi32> to vector<16x128xi32>
    %15 = arith.cmpi eq, %1, %14 : vector<16x128xi32>
    %16 = arith.extui %15 : vector<16x128xi1> to vector<16x128xi32>
    %17 = arith.sitofp %16 : vector<16x128xi32> to vector<16x128xf32>
    %18 = arith.addf %10, %17 : vector<16x128xf32>
    %19 = vector.extract_strided_slice %0 {offsets = [0, 2], sizes = [16, 1], strides = [1, 1]} : vector<16x4xi32> to vector<16x1xi32>
    %20 = vector.shape_cast %19 : vector<16x1xi32> to vector<16xi32>
    %21 = vector.shape_cast %20 : vector<16xi32> to vector<16x1xi32>
    %22 = vector.broadcast %21 : vector<16x1xi32> to vector<16x128xi32>
    %23 = arith.cmpi eq, %1, %22 : vector<16x128xi32>
    %24 = arith.extui %23 : vector<16x128xi1> to vector<16x128xi32>
    %25 = arith.sitofp %24 : vector<16x128xi32> to vector<16x128xf32>
    %26 = arith.addf %18, %25 : vector<16x128xf32>
    %27 = vector.extract_strided_slice %0 {offsets = [0, 3], sizes = [16, 1], strides = [1, 1]} : vector<16x4xi32> to vector<16x1xi32>
    %28 = vector.shape_cast %27 : vector<16x1xi32> to vector<16xi32>
    %29 = vector.shape_cast %28 : vector<16xi32> to vector<16x1xi32>
    %30 = vector.broadcast %29 : vector<16x1xi32> to vector<16x128xi32>
    %31 = arith.cmpi eq, %1, %30 : vector<16x128xi32>
    %32 = arith.extui %31 : vector<16x128xi1> to vector<16x128xi32>
    %33 = arith.sitofp %32 : vector<16x128xi32> to vector<16x128xf32>
    %34 = arith.addf %26, %33 : vector<16x128xf32>
    %35 = arith.truncf %34 : vector<16x128xf32> to vector<16x128xbf16>
    %c0_1 = arith.constant 0 : index
    %c0_2 = arith.constant 0 : index
    %36 = vector.load %arg2[%c0_1, %c0_2] : memref<128x128xbf16, #tpu.memory_space<vmem>>, vector<128x128xbf16>
    %cst_3 = arith.constant dense<0.000000e+00> : vector<16x128xf32>
    %37 = tpu.matmul %35, %36, %cst_3 {dimension_numbers = #tpu.dot_dimension_numbers<[1], [0], [0], [1], [0, 0, 1, 1], [], []>} : vector<16x128xbf16>, vector<128x128xbf16>, vector<16x128xf32> -> vector<16x128xf32>
    %c0_4 = arith.constant 0 : index
    %c0_5 = arith.constant 0 : index
    %38 = vector.load %arg3[%c0_4, %c0_5] : memref<1x128xf32, #tpu.memory_space<vmem>>, vector<1x128xf32>
    %39 = vector.broadcast %38 : vector<1x128xf32> to vector<16x128xf32>
    %40 = arith.addf %37, %39 : vector<16x128xf32>
    %c0_6 = arith.constant 0 : index
    %c0_7 = arith.constant 0 : index
    %41 = vector.load %arg4[%c0_6, %c0_7] : memref<16x128xf32, #tpu.memory_space<vmem>>, vector<16x128xf32>
    tpu.vector_store %arg4[%c0_6, %c0_7], %40 {strides = array<i32>} : memref<16x128xf32, #tpu.memory_space<vmem>>, vector<16x128xf32>,
    return
  }
  func.func @transform_0(%arg0: i32) -> (i32, i32) {
    %c0_i32 = arith.constant 0 : i32
    %c0_i32_0 = arith.constant 0 : i32
    return %arg0, %c0_i32 : i32, i32
  }
  func.func @transform_1(%arg0: i32) -> (i32, i32) {
    %c0_i32 = arith.constant 0 : i32
    %c0_i32_0 = arith.constant 0 : i32
    %c0_i32_1 = arith.constant 0 : i32
    return %c0_i32, %c0_i32_0 : i32, i32
  }
  func.func @transform_2(%arg0: i32) -> (i32, i32) {
    %c0_i32 = arith.constant 0 : i32
    %c0_i32_0 = arith.constant 0 : i32
    %c0_i32_1 = arith.constant 0 : i32
    return %c0_i32, %c0_i32_0 : i32, i32
  }
  func.func @transform_3(%arg0: i32) -> (i32, i32) {
    %c0_i32 = arith.constant 0 : i32
    %c0_i32_0 = arith.constant 0 : i32
    return %arg0, %c0_i32 : i32, i32
  }
}

</mosaic_0001>

<bundles_post_ra>
// kernel: cboh_forward.1
= control target key start
LH: loop header
LB: loop body
LE: loop exit
PB: predicated region body
PF: predicated region fallthrough
CT: control target
= control target key end

     0   :  { %8 = vsyncpa [#allocation3], 0  ;;  %s783_s0 = inlined_call_operand.vmem [shape: s32[32,4], index: 0, kind: input, shape index: {}]   ;;  %s784_s1 = inlined_call_operand.vmem [shape: bf16[128,128], index: 1, kind: input, shape index: {}]   ;;  %s785_s2 = inlined_call_operand.vmem [shape: f32[1,128], index: 2, kind: input, shape index: {}]   ;;  %s786_s3 = inlined_call_operand.hbm [shape: f32[32,128], index: 3, kind: output, shape index: {}]  }
   0x1   :  { %10 = vsyncpa [#allocation3 + $0x1], 0  ;;  %s637_s12 = smov 0   ;;  %s639_s13 = smov 0  }
   0x2   :  { %s641_s14 = smov 0   ;;  %s643_s15 = smov 0  }
   0x3 LB: > { %s658_s16 = sadd.s32 4294967295, %s606_s15   ;;  %s424_s17 = sadd.s32 4294967294, %s606_s15   ;;  %s606_s15 = sphi %s643_s15, %s792_s15   ;;  %s602_s14 = sphi %s641_s14, %s791_s14   ;;  %s598_s13 = sphi %s639_s13, %s790_s13   ;;  %s594_s12 = sphi %s637_s12, %s789_s12  }
   0x4   : > { %s662_s18 = sadd.s32 1, %s606_s15   ;;  %s91_s19 = sadd.s32 1, %s602_s14 }
   0x5   : > { %s88_s20 = ssub.s32 %s606_s15, %s662_s18  ;;  %p101_p0 = scmp.ne.s32.totalorder %s602_s14, %s598_s13 }
   0x6   : > { %p89_p1 = scmp.eq.s32.totalorder %s88_s20, 0  ;;  %p102_p2 = scmp.eq.s32.totalorder %s658_s16, 1 }
   0x7   : > { %p107_p3 = scmp.ne.s32.totalorder %s598_s13, %s594_s12  ;;  %p108_p4 = scmp.eq.s32.totalorder %s424_s17, 1 }
   0x8   : > { %s673_s21 = scalar_select %p89_p1, %s602_s14, %s91_s19  }
   0x9   : > { %p675_p5 = por %p102_p2, %p101_p0  ;;  %p679_p6 = por %p108_p4, %p107_p3 }
   0xa   : > { %p427_p7 = scmp.ge.s32.totalorder %s606_s15, 1  ;;  %p141_p8 = scmp.lt.s32.totalorder %s606_s15, 3 }
   0xc   : > { %p142_p9 = pnand %p427_p7, %p141_p8 }
   0xd   : > { %s429_s24 = sshll.u32 (!%p142_p9), %s658_s16, 1  ;;  %v536_v0 = vld [vmem:[%s784_s1] sm:$0xff] (!%p142_p9)   ;;  %v608_v1 = vmov (!%p142_p9), 1   ;;  %v609_v2 = vmov (!%p142_p9), 0   ;;  %v610_v3 = vmov (!%p142_p9), 0.0   ;;  %v537_v4 = vld [vmem:[%s784_s1 + $0x8] sm:$0xff] (!%p142_p9)   ;;  %v175_v15 = vlaneseq (!%p142_p9) }
   0xe   : > { %145 = sbr.rel (%p142_p9) target bundleno = 404 (0x194), region = 32  ;;  %531 = vset.pattern.permute.xlu1 (!%p142_p9), %v608_v1  ;;  %530 = vset.pattern.permute.xlu0 (!%p142_p9), %v609_v2  ;;  %p166_p10 = scmp.lt.s32.totalorder (!%p142_p9), %s429_s24, 3  ;;  %v538_v6 = vld [vmem:[%s784_s1 + $0x10] sm:$0xff] (!%p142_p9)   ;;  %v539_v8 = vld [vmem:[%s784_s1 + $0x18] sm:$0xff] (!%p142_p9)   ;;  %v540_v9 = vld [vmem:[%s784_s1 + $0x20] sm:$0xff] (!%p142_p9)   ;;  %v611_v10 = vmov (!%p142_p9), 2  }
   0xf   : > { %463 = vmatprep.subr.bf16.mxu0 (!%p142_p9), %v610_v3  ;;  %v541_v11 = vld [vmem:[%s784_s1 + $0x28] sm:$0xff] (!%p142_p9)   ;;  %v612_v12 = vmov (!%p142_p9), 3   ;;  %v542_v13 = vld [vmem:[%s784_s1 + $0x30] sm:$0xff] (!%p142_p9)   ;;  %vm613_vm0 = vmmov (!%p142_p9), 0   ;;  %v543_v14 = vld [vmem:[%s784_s1 + $0x38] sm:$0xff] (!%p142_p9)   ;;  %v176_v18 = vand.u32 (!%p142_p9), 127, %v175_v15 }
  0x10   : > { %464 = vmatpush3.bf16.msra.mxu0 (!%p142_p9), %v536_v0  ;;  %479 = vmatprep.mubr.msk.bf16.mxu0 (!%p142_p9), %vm613_vm0, %v610_v3  ;;  %s162_s27 = sand.u32 (!%p142_p9), 1, %s598_s13   ;;  %v439_v40 = vld [vmem:[%s785_s2] ss:$0 sm:$0xff] (!%p142_p9)  ;;  %s453_s6 = sshll.u32 (!%p142_p9), %s658_s16, 8 }
  0x11   : > { %465 = vmatprep.subr.bf16.mxu0 (!%p142_p9), %v610_v3  ;;  %s428_s28 = sshll.u32 (!%p142_p9), %s162_s27, 4  ;;  %s740_s9 = scalar_lea.hbm (!%p142_p9), %s786_s3, %s453_s6 }
  0x12   : > { %s164_s4 = scalar_lea.vmem (!%p142_p9), [#allocation2], %s428_s28  ;;  %s742_s10 = scalar_lea.sflag (!%p142_p9), [#allocation3], %s162_s27 }
  0x13   : > { %s614_s11 = smov (!%p142_p9), [#allocation2]  }
  0x14   : > { %466 = vmatpush3.bf16.msra.mxu0 (!%p142_p9), %v537_v4  ;;  %s548_s17 = sshll.u32 (!%p142_p9), %s614_s11, 4  ;;  %s549_s17 = int_to_ptr.vmem [resolvable:$false] %s548_s17 }
  0x15   : > { %s794_s24 = smov (!%p166_p10, %s429_s24), 3  ;;  %467 = vmatprep.subr.bf16.mxu0 %v610_v3  ;;  %s550_s19 = scalar_lea.vmem %s549_s17, 512 }
  0x16   : > { %s430_s29 = sshll.u32 %s794_s24, 3 }
  0x17   : > { %s169_s5 = scalar_lea.vmem %s783_s0, %s430_s29 }
  0x18   : > { %v173_v5 = vld [vmem:[%s169_s5] sm:$0xff]  ;;  %v174_v7 = vld [vmem:[%s169_s5 + $0x8] sm:$0xff]  ;;  %468 = vmatpush3.bf16.msra.mxu0 %v538_v6  ;;  %s362_s5 = sshll.u32 %s164_s4, 4  ;;  %s735_s5 = int_to_ptr.vmem [resolvable:$true] %s362_s5 }
  0x19   : > { %192 = vperm.xlu1 %531, %v173_v5   ;;  %178 = vperm.xlu0 %530, %v173_v5   ;;  %s544_s16 = scalar_lea.vmem %s735_s5, 256  ;;  %p551_p0 = scmp.lt.s32.totalorder %s735_s5, %s549_s17 }
  0x1a   : > { %469 = vmatprep.subr.bf16.mxu0 %v610_v3  ;;  %p545_p11 = scmp.ne.s32.totalorder %s735_s5, %s544_s16  ;;  %p552_p1 = scmp.lt.s32.totalorder %s550_s19, %s544_s16 }
  0x1c   : > { %470 = vmatpush3.bf16.msra.mxu0 %v539_v8  ;;  %p546_p12 = pnand %p545_p11, %p675_p5  ;;  %p553_p2 = por %p552_p1, %p551_p0 }
  0x1d   : > { %195 = vperm.xlu1 %531, %v174_v7   ;;  %181 = vperm.xlu0 %530, %v174_v7  }
  0x1e   : > { %471 = vmatprep.subr.bf16.mxu0 %v610_v3  ;;  %p547_p13 = pneg %p546_p12 }
  0x20   : > { %472 = vmatpush3.bf16.msra.mxu0 %v540_v9  ;;  %p554_p3 = pnand %p553_p2, %p547_p13 }
  0x21   : > { %533 = vset.pattern.permute.xlu1 %v611_v10  ;;  %532 = vset.pattern.permute.xlu0 %v611_v10 }
  0x22   : > { %209 = vperm.xlu1 %533, %v174_v7   ;;  %206 = vperm.xlu0 %532, %v173_v5  }
  0x23   : > { %473 = vmatprep.subr.bf16.mxu0 %v610_v3 }
  0x24   : > { %474 = vmatpush3.bf16.msra.mxu0 %v541_v11 }
  0x25   : > { %475 = vmatprep.subr.bf16.mxu0 %v610_v3 }
  0x26   : > { %534 = vset.pattern.permute.xlu1 %v612_v12  ;;  %535 = vset.pattern.permute.xlu0 %v612_v12 }
  0x27   : > { %220 = vperm.xlu1 %534, %v173_v5   ;;  %223 = vperm.xlu0 %535, %v174_v7  }
  0x28   : > { %476 = vmatpush3.bf16.msra.mxu0 %v542_v13 }
  0x29   : > { %477 = vmatprep.subr.bf16.mxu0 %v610_v3 }
  0x2c   : > { %478 = vmatpush3.bf16.msra.mxu0 %v543_v14 }
  0x98   : > { %v193_v16 = vpop.permute.xlu1 %192  ;;  %v179_v17 = vpop.permute.xlu0 %178 }
  0x99   : > { %vm197_vm1 = vcmp.eq.s32.totalorder %v176_v18, %v193_v16  ;;  %vm183_vm2 = vcmp.eq.s32.totalorder %v176_v18, %v179_v17 }
  0x9a   : > { %v433_v21 = vsel %vm197_vm1, 1.0, %v610_v3  ;;  %v431_v22 = vsel %vm183_vm2, 1.0, %v610_v3 }
  0x9b   : > { %v203_v29 = vadd.f32 %v433_v21, %v431_v22 }
  0x9c   : > { %v196_v19 = vpop.permute.xlu1 %195  ;;  %v182_v20 = vpop.permute.xlu0 %181 }
  0x9d   : > { %vm198_vm3 = vcmp.eq.s32.totalorder %v176_v18, %v196_v19  ;;  %vm184_vm4 = vcmp.eq.s32.totalorder %v176_v18, %v182_v20 }
  0x9e   : > { %v434_v25 = vsel %vm198_vm3, 1.0, %v610_v3  ;;  %v432_v26 = vsel %vm184_vm4, 1.0, %v610_v3 }
  0x9f   : > { %v204_v30 = vadd.f32 %v434_v25, %v432_v26 }
  0xa1   : > { %v210_v23 = vpop.permute.xlu1 %209  ;;  %v207_v24 = vpop.permute.xlu0 %206 }
  0xa2   : > { %vm212_vm5 = vcmp.eq.s32.totalorder %v176_v18, %v210_v23  ;;  %vm211_vm6 = vcmp.eq.s32.totalorder %v176_v18, %v207_v24 }
  0xa3   : > { %v436_v27 = vsel %vm212_vm5, 1.0, %v610_v3  ;;  %v435_v28 = vsel %vm211_vm6, 1.0, %v610_v3 }
  0xa4   : > { %v218_v33 = vadd.f32 %v436_v27, %v204_v30  ;;  %v217_v34 = vadd.f32 %v435_v28, %v203_v29 }
  0xa6   : > { %v221_v31 = vpop.permute.xlu1 %220  ;;  %v224_v32 = vpop.permute.xlu0 %223 }
  0xa7   : > { %vm225_vm7 = vcmp.eq.s32.totalorder %v176_v18, %v221_v31  ;;  %vm226_vm8 = vcmp.eq.s32.totalorder %v176_v18, %v224_v32 }
  0xa8   : > { %v437_v35 = vsel %vm225_vm7, 1.0, %v610_v3  ;;  %v438_v36 = vsel %vm226_vm8, 1.0, %v610_v3 }
  0xa9   : > { %v231_v37 = vadd.f32 %v437_v35, %v217_v34  ;;  %v232_v38 = vadd.f32 %v438_v36, %v218_v33 }
  0xab   : > { %v233_v39 = vpack.c.bf16 %v232_v38, %v231_v37 }
  0xad   : > { %480 = vmatmul.mubr.bf16.vlgmr.msra.gmra.mrb[0].mxu0 %v233_v39 }
 0x180   : > { %v339_v41 = vpop.f32.mrb[0].mxu0 }
 0x181   : > { %v340_v42 = vadd.f32 %v439_v40, %v339_v41  ;;  %v481_v43 = vpop.f32.mrb[1].mxu0 }
 0x182   : > { %v342_v44 = vpop.f32.mrb[2].mxu0 }
 0x183   : > { %346 = vst [vmem:[%s164_s4] sm:$0xff] %v340_v42  ;;  %v343_v45 = vadd.f32 %v439_v40, %v342_v44  ;;  %v482_v46 = vpop.f32.mrb[3].mxu0 }
 0x185   : > { %347 = vst [vmem:[%s164_s4 + $0x8] sm:$0xff] %v343_v45 }
 0x186   : > { %557 = shalt.err (!%p554_p3)
}
 0x187   : > { %s558_s20 = scalar_lea.hbm %s740_s9, 256  ;;  %s562_s26 = scalar_lea.hbm %s786_s3, 512 }
 0x188   : > { %p559_p4 = scmp.ne.s32.totalorder %s740_s9, %s558_s20  ;;  %p563_p9 = scmp.lt.u32.totalorder %s740_s9, %s786_s3 }
 0x189   : > { %p564_p10 = scmp.lt.u32.totalorder %s562_s26, %s558_s20  ;;  %p566_p12 = scmp.lt.u32.totalorder %s558_s20, %s740_s9 }
 0x18a   : > { %p560_p7 = pnand %p559_p4, %p675_p5 }
 0x18b   : > { %p565_p11 = por %p564_p10, %p563_p9 }
 0x18c   : > { %p561_p8 = pneg %p560_p7 }
 0x18d   : > { %p567_p13 = por %p566_p12, %p565_p11 }
 0x18f   : > { %p568_p0 = pnand %p567_p13, %p561_p8 }
 0x191   : > { %571 = shalt.err (!%p568_p0)
}
 0x192   : > { %s615_s29 = smov 128   ;;  %s616_s30 = smov 8  }
 0x193   : > { %483 = dma.vmem_to_hbm [thread:$0]  (%p675_p5), %s735_s5, 256, %s740_s9, %s742_s10, %s615_s29, %s615_s29, %s616_s30  }
 0x194 PF: > { %p489_p1 = scmp.ge.s32.totalorder %s606_s15, 2  ;;  %s377_s4 = sand.u32 1, %s594_s12  }
 0x195   : > { %s378_s6 = scalar_lea.sflag [#allocation3], %s377_s4 }
 0x196   : > { %p486_p2 = pnand %p489_p1, %p679_p6 }
 0x198   : > { %589 = dma.done.wait (!%p486_p2), %s378_s6, 256  }
 0x199   : > { %591 = vsyncadd (!%p486_p2), %s378_s6, 4294967040  ;;  %p13_p3 = scmp.ge.s32.totalorder %s662_s18, 4   ;;  %s789_s12 = smov %s598_s13 }
 0x19a   : > { %s790_s13 = smov %s602_s14  ;;  %s791_s14 = smov %s673_s21 }
 0x19b   : > { %s792_s15 = smov %s662_s18  ;;  %15 = sbr.rel (!%p13_p3) target bundleno = 3 (0x3), region = 67 }
 0x1a2   :  { %383 = vsyncpa [#allocation3], 1 }
 0x1a3   :  { %385 = vsyncpa [#allocation3 + $0x1], 1 }

</bundles_post_ra>
